<compile_context>
chip_gen: v5e
topology: v5e:2x2
jax: 0.10.0
libtpu: 0.0.40
codegen_flags: <defaults>
</compile_context>

<pallas_src>
import functools

import jax
import jax.numpy as jnp
from jax import lax
from jax.experimental import pallas as pl
from jax.experimental.pallas import tpu as pltpu


def _rmsnorm_kernel(x_ref, g_ref, o_ref, *, eps):
    """One grid step normalizes a (br, E) tile of flattened tokens."""
    x = x_ref[...].astype(jnp.float32)                 # (br, E)  VPU math in f32
    g = g_ref[...]                                     # (1, E)   pre-cast f32 scale

    ms = jnp.mean(x * x, axis=-1, keepdims=True)       # (br, 1)  XLU cross-lane reduce
    inv = lax.rsqrt(ms + jnp.float32(eps))             # EUP slot (near-free)

    o_ref[...] = (x * inv * g).astype(o_ref.dtype)     # lane-dense store (E mult. of 128)


def _round_up(x, m):
    return ((x + m - 1) // m) * m


def _choose_block_rows(n_rows, emb, dtype, vmem_budget_bytes):
    """Row tile from an explicit VMEM budget (double-buffered in + out)."""
    itemsize = jnp.dtype(dtype).itemsize
    # Sublane multiple so packed dtypes (bf16/int8) stay on native tiles.
    sub_mult = max(8, 8 * (4 // max(1, itemsize)))
    # footprint ~= 2 * br * E * in_bytes + 2 * br * E * out_bytes  (in==out dtype)
    per_row_bytes = 2 * emb * (2 * itemsize)
    br_budget = max(sub_mult, (vmem_budget_bytes // per_row_bytes) // sub_mult * sub_mult)
    # At least 2 grid steps when rows allow it -> both v7x TensorCores busy.
    half_rows = _round_up(max(1, -(-n_rows // 2)), sub_mult)
    return max(sub_mult, min(br_budget, half_rows))


def rmsnorm(x, gamma, *, eps=1e-6, vmem_budget_bytes=24 << 20,
            small_input_fallback=True):
    """RMSNorm over the last axis of x. x: (..., E), gamma: (E,)."""
    orig_shape = x.shape
    E = orig_shape[-1]
    N = 1
    for d in orig_shape[:-1]:
        N *= int(d)

    # Tiny problems: XLA fuses this elementwise chain fine; pallas_call launch
    # plus per-step overhead would dominate.
    if small_input_fallback and N * E * jnp.dtype(x.dtype).itemsize < (1 << 20):
        return rmsnorm_reference(x, gamma, eps)

    xf = x.reshape(N, E)                               # tokens on sublanes, E on lanes
    br = _choose_block_rows(N, E, x.dtype, vmem_budget_bytes)
    grid = (pl.cdiv(N, br),)                           # ragged tail handled by Pallas masking

    gamma_f32 = gamma.astype(jnp.float32).reshape(1, E)

    itemsize = jnp.dtype(x.dtype).itemsize
    footprint = 2 * br * E * (2 * itemsize) + 2 * E * 4    # in/out double buffers + gamma
    vmem_limit = int(min(48 << 20, max(footprint + (4 << 20), 16 << 20)))

    out = pl.pallas_call(
        functools.partial(_rmsnorm_kernel, eps=eps),
        out_shape=jax.ShapeDtypeStruct((N, E), x.dtype),
        grid_spec=pltpu.PrefetchScalarGridSpec(
            num_scalar_prefetch=0,
            grid=grid,
            in_specs=[
                pl.BlockSpec((br, E), lambda i: (i, 0)),    # x row tile
                pl.BlockSpec((1, E), lambda i: (0, 0)),     # gamma (replicated, lane-dense)
            ],
            out_specs=pl.BlockSpec((br, E), lambda i: (i, 0)),
        ),
        compiler_params=pltpu.CompilerParams(
            dimension_semantics=("parallel",),              # independent rows -> megacore/v7x TCs
            vmem_limit_bytes=vmem_limit,
        ),
    )(xf, gamma_f32)

    return out.reshape(orig_shape)


def rmsnorm_reference(x, gamma, eps=1e-6):
    """Plain-JAX reference matching the PyTorch Normalization forward (eval mode)."""
    xf = x.astype(jnp.float32)
    ms = jnp.mean(jnp.square(xf), axis=-1, keepdims=True)
    y = xf * lax.rsqrt(ms + jnp.float32(eps)) * gamma.astype(jnp.float32)
    return y.astype(x.dtype)


if __name__ == "__main__":
    # Shapes consistent with the module: embeddings_dims = 768 (ModelArgs),
    # tiny batch/sequence for the test.
    B, T, E = 2, 8, 768

    key = jax.random.PRNGKey(0)
    k1, k2 = jax.random.split(key)
    x = jax.random.normal(k1, (B, T, E), jnp.float32)
    # Learnable scale (init = 1 in the module); perturb so the multiply is exercised.
    gamma = jnp.ones((E,), jnp.float32) + 0.1 * jax.random.normal(k2, (E,), jnp.float32)

    # f32 path (force the Pallas kernel even at this tiny size).
    out = jax.block_until_ready(rmsnorm(x, gamma, small_input_fallback=False))
    ref = rmsnorm_reference(x, gamma)
    assert out.shape == (B, T, E)
    assert jnp.allclose(out, ref, rtol=1e-5, atol=1e-5), "f32 kernel/reference mismatch"

    # bf16 I/O path (halves HBM bytes; in-kernel math stays f32).
    xb = x.astype(jnp.bfloat16)
    outb = jax.block_until_ready(rmsnorm(xb, gamma, small_input_fallback=False))
    refb = rmsnorm_reference(xb, gamma)
    assert outb.dtype == jnp.bfloat16
    assert jnp.allclose(outb.astype(jnp.float32), refb.astype(jnp.float32),
                        rtol=2e-2, atol=2e-2), "bf16 kernel/reference mismatch"

    print("KERNEL_OK")
</pallas_src>

<mosaic_0001>
module attributes {stable_mosaic.version = 11 : i64} {
  func.func @_rmsnorm_kernel(%arg0: i32, %arg1: memref<8x768xf32, #tpu.memory_space<vmem>>, %arg2: memref<1x768xf32, #tpu.memory_space<vmem>>, %arg3: memref<8x768xf32, #tpu.memory_space<vmem>>) attributes {dimension_semantics = [#tpu.dimension_semantics<parallel>], iteration_bounds = array<i64: 2>, scalar_prefetch = 0 : i64, scratch_operands = 0 : i64, tpu.core_type = #tpu.core_type<tc>, window_params = [{transform_indices = @transform_0, window_bounds = array<i64: 8, 768>}, {pipeline_mode = #tpu.pipeline_mode<synchronous>, transform_indices = @transform_1, window_bounds = array<i64: 1, 768>}, {transform_indices = @transform_2, window_bounds = array<i64: 8, 768>}]} {
    %c0 = arith.constant 0 : index
    %c0_0 = arith.constant 0 : index
    %0 = vector.load %arg1[%c0, %c0_0] : memref<8x768xf32, #tpu.memory_space<vmem>>, vector<8x768xf32>
    %c0_1 = arith.constant 0 : index
    %c0_2 = arith.constant 0 : index
    %1 = vector.load %arg2[%c0_1, %c0_2] : memref<1x768xf32, #tpu.memory_space<vmem>>, vector<1x768xf32>
    %2 = arith.mulf %0, %0 : vector<8x768xf32>
    %cst = arith.constant dense<0.000000e+00> : vector<8xf32>
    %3 = vector.multi_reduction <add>, %2, %cst [1] : vector<8x768xf32> to vector<8xf32>
    %4 = vector.shape_cast %3 : vector<8xf32> to vector<8x1xf32>
    %cst_3 = arith.constant 7.680000e+02 : f32
    %5 = vector.broadcast %cst_3 : f32 to vector<8x1xf32>
    %6 = arith.divf %4, %5 : vector<8x1xf32>
    %cst_4 = arith.constant 9.99999997E-7 : f32
    %7 = vector.broadcast %cst_4 : f32 to vector<8x1xf32>
    %8 = arith.addf %6, %7 : vector<8x1xf32>
    %9 = math.rsqrt %8 : vector<8x1xf32>
    %10 = vector.broadcast %9 : vector<8x1xf32> to vector<8x768xf32>
    %11 = arith.mulf %0, %10 : vector<8x768xf32>
    %12 = vector.broadcast %1 : vector<1x768xf32> to vector<8x768xf32>
    %13 = arith.mulf %11, %12 : vector<8x768xf32>
    %c0_5 = arith.constant 0 : index
    %c0_6 = arith.constant 0 : index
    %14 = vector.load %arg3[%c0_5, %c0_6] : memref<8x768xf32, #tpu.memory_space<vmem>>, vector<8x768xf32>
    tpu.vector_store %arg3[%c0_5, %c0_6], %13 {strides = array<i32>} : memref<8x768xf32, #tpu.memory_space<vmem>>, vector<8x768xf32>,
    return
  }
  func.func @transform_0(%arg0: i32) -> (i32, i32) {
    %c0_i32 = arith.constant 0 : i32
    %c0_i32_0 = arith.constant 0 : i32
    return %arg0, %c0_i32 : i32, i32
  }
  func.func @transform_1(%arg0: i32) -> (i32, i32) {
    %c0_i32 = arith.constant 0 : i32
    %c0_i32_0 = arith.constant 0 : i32
    %c0_i32_1 = arith.constant 0 : i32
    return %c0_i32, %c0_i32_0 : i32, i32
  }
  func.func @transform_2(%arg0: i32) -> (i32, i32) {
    %c0_i32 = arith.constant 0 : i32
    %c0_i32_0 = arith.constant 0 : i32
    return %arg0, %c0_i32 : i32, i32
  }
}

</mosaic_0001>

<bundles_post_ra>
// kernel: tpu_custom_call.1
= control target key start
LH: loop header
LB: loop body
LE: loop exit
PB: predicated region body
PF: predicated region fallthrough
CT: control target
= control target key end

     0   :  { %7 = vsyncpa [#allocation3], 0  ;;  %s711_s0 = inlined_call_operand.hbm [shape: f32[16,768], index: 0, kind: input, shape index: {}]   ;;  %s712_s1 = inlined_call_operand.hbm [shape: f32[1,768], index: 1, kind: input, shape index: {}]   ;;  %s713_s2 = inlined_call_operand.hbm [shape: f32[16,768], index: 2, kind: output, shape index: {}]  }
   0x1   :  { %9 = vsyncpa [#allocation3 + $0x1], 0 }
   0x2   :  { %10 = vsyncpa [#allocation6], 0 }
   0x3   :  { %11 = vsyncpa [#allocation4], 0 }
   0x4   :  { %13 = vsyncpa [#allocation4 + $0x1], 0  ;;  %s569_s9 = smov 0   ;;  %s571_s10 = smov 0  }
   0x5   :  { %s573_s11 = smov 0   ;;  %s575_s12 = smov 0  }
   0x6 LB: > { %s590_s13 = sadd.s32 4294967295, %s550_s12   ;;  %s344_s14 = sadd.s32 4294967294, %s550_s12   ;;  %s550_s12 = sphi %s575_s12, %s723_s12   ;;  %s546_s11 = sphi %s573_s11, %s722_s11   ;;  %s542_s10 = sphi %s571_s10, %s721_s10   ;;  %s538_s9 = sphi %s569_s9, %s720_s9  }
   0x7   : > { %p39_p0 = scmp.ne.s32.totalorder %s542_s10, %s538_s9  ;;  %p40_p1 = scmp.eq.s32.totalorder %s590_s13, 0 }
   0x8   : > { %p84_p2 = scmp.eq.s32.totalorder %s590_s13, 1  ;;  %p90_p3 = scmp.eq.s32.totalorder %s344_s14, 1 }
   0x9   : > { %p599_p4 = por %p40_p1, %p39_p0  ;;  %p345_p5 = scmp.ge.s32.totalorder %s550_s12, 1 }
   0xa   : > { %p604_p6 = por %p90_p3, %p39_p0  ;;  %p97_p7 = scmp.lt.s32.totalorder %s550_s12, 3 }
   0xb   : > { %s109_s19 = sshll.u32 %s712_s1, 4  ;;  %s552_s21 = smov [#allocation5]   ;;  %s110_s19 = int_to_ptr.hbm [resolvable:$true] %s109_s19 }
   0xc   : > { %p612_p8 = pnand %p345_p5, %p97_p7  ;;  %s111_s22 = sshll.u32 %s552_s21, 4  ;;  %s112_s22 = int_to_ptr.vmem [resolvable:$true] %s111_s22 }
   0xd   : > { %s622_s23 = sadd.s32 1, %s550_s12   ;;  %s26_s24 = sadd.s32 1, %s546_s11 }
   0xe   : > { %p366_p10 = pneg %p612_p8  ;;  %s23_s25 = ssub.s32 %s550_s12, %s622_s23 }
   0xf   : > { %p24_p12 = scmp.eq.s32.totalorder %s23_s25, 0  ;;  %p33_p13 = scmp.ne.s32.totalorder %s546_s11, %s542_s10 }
  0x10   : > { %p367_p11 = pnand %p366_p10, %p40_p1  ;;  %p34_p0 = scmp.eq.s32.totalorder %s550_s12, 0 }
  0x11   : > { %p379_p3 = scmp.lt.s32.totalorder %s550_s12, 2  ;;  %p636_p7 = por %p84_p2, %p33_p13 }
  0x12   : > { %369 = dma.hbm_to_vmem [thread:$0]  (!%p367_p11), %s110_s19, 96, %s112_s22, [#allocation6]  }
  0x13   : > { %s632_s26 = scalar_select %p24_p12, %s546_s11, %s26_s24  }
  0x14   : > { %p35_p5 = por %p34_p0, %p33_p13  ;;  %s122_s28 = sand.u32 1, %s546_s11  }
  0x15   : > { %s355_s29 = smul.u32 48, %s550_s12  ;;  %s123_s17 = scalar_lea.sflag [#allocation3], %s122_s28 }
  0x16   : > { %s354_s30 = smul.u32 48, %s122_s28  ;;  %p645_p10 = pnand %p379_p3, %p35_p5 }
  0x17   : > { %s131_s5 = scalar_lea.hbm %s711_s0, %s355_s29  ;;  %s457_s24 = scalar_lea.hbm %s711_s0, 96 }
  0x18   : > { %s133_s7 = sshll.u32 %s131_s5, 4  ;;  %s126_s8 = scalar_lea.vmem [#allocation2], %s354_s30  ;;  %s134_s7 = int_to_ptr.hbm [resolvable:$true] %s133_s7 }
  0x19   : > { %s135_s14 = sshll.u32 %s126_s8, 4  ;;  %s450_s18 = sshra.s32 %s134_s7, 4  ;;  %s136_s14 = int_to_ptr.vmem [resolvable:$true] %s135_s14  ;;  %s451_s18 = int_to_ptr.hbm [resolvable:$true] %s450_s18 }
  0x1a   : > { %s452_s19 = scalar_lea.hbm %s451_s18, 48  ;;  %p454_p11 = pneg %p645_p10 }
  0x1b   : > { %p453_p2 = scmp.ne.s32.totalorder %s451_s18, %s452_s19  ;;  %p458_p0 = scmp.lt.s32.totalorder %s451_s18, %s711_s0 }
  0x1c   : > { %p459_p3 = scmp.lt.s32.totalorder %s457_s24, %s452_s19 }
  0x1d   : > { %p455_p12 = pnand %p454_p11, %p453_p2 }
  0x1e   : > { %p460_p5 = por %p459_p3, %p458_p0 }
  0x1f   : > { %p456_p13 = pneg %p455_p12 }
  0x21   : > { %p461_p9 = pnand %p460_p5, %p456_p13 }
  0x23   : > { %464 = shalt.err (!%p461_p9)
}
  0x24   : > { %373 = dma.hbm_to_vmem [thread:$0]  (!%p645_p10), %s134_s7, 768, %s136_s14, %s123_s17  }
  0x25   : > { %144 = sbr.rel (%p612_p8) target bundleno = 208 (0xd0), region = 28  ;;  %s662_s28 = sand.u32 (!%p612_p8), 1, %s542_s10  }
  0x26   : > { %s356_s30 = smul.u32 (!%p612_p8), 48, %s662_s28  ;;  %s147_s3 = scalar_lea.sflag (!%p612_p8), [#allocation3], %s662_s28 }
  0x28   : > { %s150_s4 = scalar_lea.vmem (!%p612_p8), [#allocation2], %s356_s30 }
  0x2a   : > { %525 = dma.done.wait (%p599_p4), %s147_s3, 768  }
  0x2b   : > { %527 = vsyncadd (%p599_p4), %s147_s3, 4294966528 }
  0x2c   : > { %529 = dma.done.wait (%p40_p1), [#allocation6], 96  }
  0x2d   : > { %531 = vsyncadd (%p40_p1), [#allocation6], 4294967200  ;;  %v177_v0 = vld [vmem:[%s150_s4] sm:$0xff]  ;;  %v178_v1 = vld [vmem:[%s150_s4 + $0x8] sm:$0xff]  ;;  %v553_v17 = vmov 768.0   ;;  %s357_s15 = smul.u32 48, %s590_s13 }
  0x2e   : > { %v179_v2 = vld [vmem:[%s150_s4 + $0x10] sm:$0xff]  ;;  %v180_v3 = vld [vmem:[%s150_s4 + $0x18] sm:$0xff]  ;;  %v184_v4 = vmul.f32 %v177_v0, %v177_v0  ;;  %v185_v5 = vmul.f32 %v178_v1, %v178_v1  ;;  %v181_v7 = vld [vmem:[%s150_s4 + $0x20] sm:$0xff]  ;;  %416 = vrcp.f32 %v553_v17  ;;  %s176_s13 = scalar_lea.vmem [#allocation7], %s356_s30  ;;  %s248_s14 = scalar_lea.sflag [#allocation4], %s662_s28 }
  0x2f   : > { %v186_v6 = vmul.f32 %v179_v2, %v179_v2  ;;  %v187_v8 = vmul.f32 %v180_v3, %v180_v3  ;;  %v182_v10 = vld [vmem:[%s150_s4 + $0x28] sm:$0xff]  ;;  %v188_v11 = vmul.f32 %v181_v7, %v181_v7  ;;  %v183_v31 = vld [vmem:[#allocation5] sm:$0x3f]  ;;  %s259_s6 = scalar_lea.hbm %s713_s2, %s357_s15  ;;  %s261_s7 = sshll.u32 %s176_s13, 4  ;;  %s262_s7 = int_to_ptr.vmem [resolvable:$true] %s261_s7 }
  0x30   : > { %v190_v9 = vadd.f32 %v185_v5, %v184_v4  ;;  %v189_v13 = vmul.f32 %v182_v10, %v182_v10  ;;  %v223_v34 = vperm.slane %v183_v31, 0  ;;  %v224_v35 = vperm.slane %v183_v31, 1  ;;  %s263_s8 = sshll.u32 %s259_s6, 4  ;;  %s500_s22 = scalar_lea.hbm %s713_s2, 96  ;;  %s264_s8 = int_to_ptr.hbm [resolvable:$true] %s263_s8 }
  0x31   : > { %v225_v36 = vperm.slane %v183_v31, 2  ;;  %v226_v38 = vperm.slane %v183_v31, 3  ;;  %v227_v39 = vperm.slane %v183_v31, 4  ;;  %v228_v46 = vperm.slane %v183_v31, 5  ;;  %s494_s17 = sshra.s32 %s264_s8, 4  ;;  %s495_s17 = int_to_ptr.hbm [resolvable:$true] %s494_s17 }
  0x32   : > { %v191_v12 = vadd.f32 %v190_v9, %v186_v6  ;;  %s496_s18 = scalar_lea.hbm %s495_s17, 48  ;;  %p501_p9 = scmp.lt.s32.totalorder %s495_s17, %s713_s2 }
  0x33   : > { %p497_p1 = scmp.ne.s32.totalorder %s495_s17, %s496_s18  ;;  %p502_p10 = scmp.lt.s32.totalorder %s500_s22, %s496_s18 }
  0x34   : > { %v192_v14 = vadd.f32 %v191_v12, %v187_v8  ;;  %v417_v18 = vpop.eup %416 }
  0x35   : > { %v198_v19 = vmul.f32 768.0, %v417_v18  ;;  %vm202_vm0 = vweird.f32 %v417_v18  ;;  %p498_p4 = pnand %p497_p1, %p636_p7  ;;  %p503_p2 = por %p502_p10, %p501_p9 }
  0x36   : > { %v193_v15 = vadd.f32 %v192_v14, %v188_v11 }
  0x37   : > { %v199_v20 = vsub.f32 1.0, %v198_v19  ;;  %p499_p8 = pneg %p498_p4 }
  0x38   : > { %v194_v16 = vadd.f32 %v193_v15, %v189_v13 }
  0x39   : > { %v200_v21 = vmul.f32 %v417_v18, %v199_v20  ;;  %p504_p11 = pnand %p503_p2, %p499_p8 }
  0x3a   : > { %195 = vadd.xlane.f32.xlu0 %v194_v16 }
  0x3b   : > { %v201_v22 = vadd.f32 %v417_v18, %v200_v21 }
  0x3d   : > { %v203_v23 = vsel %vm202_vm0, %v417_v18, %v201_v22 }
  0xad   : > { %v196_v24 = vpop.xlane.xlu0 %195 }
  0xae   : > { %v204_v25 = vmul.f32 %v203_v23, %v196_v24 }
  0xb0   : > { %v205_v26 = vadd.f32 1e-06, %v204_v25 }
  0xb2   : > { %418 = vrsqrt.f32 %v205_v26  ;;  %vm212_vm2 = vweird.f32 %v205_v26 }
  0xb8   : > { %v419_v27 = vpop.eup %418 }
  0xb9   : > { %v207_v28 = vmul.f32 %v419_v27, %v205_v26  ;;  %vm213_vm1 = vweird.f32 %v419_v27 }
  0xba   : > { %vm214_vm3 = vmor %vm212_vm2, %vm213_vm1 }
  0xbb   : > { %v208_v29 = vmul.f32 %v419_v27, %v207_v28 }
  0xbd   : > { %v209_v30 = vmul.f32 0.5, %v208_v29 }
  0xbf   : > { %v210_v32 = vsub.f32 1.5, %v209_v30 }
  0xc1   : > { %v211_v33 = vmul.f32 %v419_v27, %v210_v32 }
  0xc3   : > { %v215_v37 = vsel %vm214_vm3, %v419_v27, %v211_v33 }
  0xc4   : > { %v216_v40 = vmul.f32 %v215_v37, %v177_v0  ;;  %v217_v41 = vmul.f32 %v215_v37, %v178_v1  ;;  %v218_v42 = vmul.f32 %v215_v37, %v179_v2  ;;  %v219_v43 = vmul.f32 %v215_v37, %v180_v3 }
  0xc5   : > { %v220_v44 = vmul.f32 %v215_v37, %v181_v7  ;;  %v221_v45 = vmul.f32 %v215_v37, %v182_v10 }
  0xc6   : > { %v235_v47 = vmul.f32 %v223_v34, %v216_v40  ;;  %v236_v48 = vmul.f32 %v224_v35, %v217_v41  ;;  %v237_v49 = vmul.f32 %v225_v36, %v218_v42  ;;  %v238_v50 = vmul.f32 %v226_v38, %v219_v43 }
  0xc7   : > { %v239_v51 = vmul.f32 %v227_v39, %v220_v44  ;;  %v240_v52 = vmul.f32 %v228_v46, %v221_v45 }
  0xc8   : > { %241 = vst [vmem:[%s176_s13] sm:$0xff] %v235_v47 }
  0xc9   : > { %242 = vst [vmem:[%s176_s13 + $0x8] sm:$0xff] %v236_v48 }
  0xca   : > { %243 = vst [vmem:[%s176_s13 + $0x10] sm:$0xff] %v237_v49 }
  0xcb   : > { %244 = vst [vmem:[%s176_s13 + $0x18] sm:$0xff] %v238_v50 }
  0xcc   : > { %245 = vst [vmem:[%s176_s13 + $0x20] sm:$0xff] %v239_v51 }
  0xcd   : > { %246 = vst [vmem:[%s176_s13 + $0x28] sm:$0xff] %v240_v52 }
  0xce   : > { %507 = shalt.err (!%p504_p11)
}
  0xcf   : > { %364 = dma.vmem_to_hbm [thread:$0]  (%p636_p7), %s262_s7, 768, %s264_s8, %s248_s14  }
  0xd0 PF: > { %s275_s29 = sand.u32 1, %s538_s9   ;;  %p719_p12 = scmp.ge.s32.totalorder %s550_s12, 2 }
  0xd1   : > { %s276_s28 = scalar_lea.sflag [#allocation4], %s275_s29 }
  0xd2   : > { %p375_p13 = pnand %p719_p12, %p604_p6 }
  0xd4   : > { %p376_p0 = pneg %p375_p13 }
  0xd6   : > { %533 = dma.done.wait (%p376_p0), %s276_s28, 768  }
  0xd7   : > { %535 = vsyncadd (%p376_p0), %s276_s28, 4294966528  ;;  %p16_p3 = scmp.ge.s32.totalorder %s622_s23, 4   ;;  %s720_s9 = smov %s542_s10 }
  0xd8   : > { %s721_s10 = smov %s546_s11  ;;  %s722_s11 = smov %s632_s26 }
  0xd9   : > { %s723_s12 = smov %s622_s23  ;;  %18 = sbr.rel (!%p16_p3) target bundleno = 6 (0x6), region = 77 }
  0xde   :  { %282 = vsyncpa [#allocation3], 1 }
  0xdf   :  { %284 = vsyncpa [#allocation3 + $0x1], 1 }
  0xe0   :  { %285 = vsyncpa [#allocation6], 1 }
  0xe1   :  { %286 = vsyncpa [#allocation4], 1 }
  0xe2   :  { %288 = vsyncpa [#allocation4 + $0x1], 1 }

</bundles_post_ra>
